<compile_context>
chip_gen: v7x
topology: tpu7x:2x2x1
jax: 0.10.0
libtpu: 0.0.40
codegen_flags: <defaults>
</compile_context>

<pallas_src>
import jax
import jax.numpy as jnp
from jax import lax
from jax.experimental import pallas as pl
from jax.experimental.pallas import tpu as pltpu


def _round_up(x, m):
    return -(-x // m) * m


def dqn_linear_kernel(obs_ref, cmd_ref, w1a_ref, w1b_ref, b1_ref, w2_ref,
                      b2_ref, o_ref):
    # obs: [TB, obs_size]   cmd: [TB, cmd_size]      (bf16 by default)
    # w1a: [H, obs_size]    w1b: [H, cmd_size]       (layer-1 weight, split)
    # b1:  [H, 1] f32       w2:  [H, 1] f32          (VMEM columns)
    # b2:  (1, 1) f32 scalar in SMEM
    # o:   [1, TB] f32      (lane-dense: batch lives on the lane axis)
    obs = obs_ref[...]
    cmd = cmd_ref[...]

    # Layer 1 with the concat fused via split-K; both contractions are on the
    # minor (lane) dim of both operands => MXU-native, no activation
    # transpose.  f32 accumulation regardless of the (bf16) operand dtype.
    h = lax.dot_general(w1a_ref[...], obs, (((1,), (1,)), ((), ())),
                        preferred_element_type=jnp.float32)
    # NOTE: on v7x, verify in the bundle dump that this second product
    # accumulates in the MRB rather than popping a second [H, tb] f32 slab
    # and adding on the VPU.
    h = h + lax.dot_general(w1b_ref[...], cmd, (((1,), (1,)), ((), ())),
                            preferred_element_type=jnp.float32)
    # Bias + ReLU on the VPU (f32).  b1 is an [H, 1] column broadcast along
    # lanes; the splat is H*128 elems per grid step (negligible).
    h = jnp.maximum(h + b1_ref[...], 0.0)

    # Layer 2 (out_features == 1): VPU multiply + sublane (XLU) reduction over
    # H instead of an N=1 MXU matmul.  b2 added as an SMEM scalar.
    q = jnp.sum(h * w2_ref[...], axis=0, keepdims=True) + b2_ref[0, 0]
    o_ref[...] = q.astype(o_ref.dtype)     # lane-dense [1, TB] store


def dqn_linear_forward(obs, cmd, params, *,
                       block_b=8192,
                       min_pallas_batch=1024,
                       min_grid_steps=4,
                       compute_dtype=jnp.bfloat16,
                       vmem_working_budget=40 << 20):
    """Forward pass of DQNLinear: net(cat(obs, cmd, dim=1)) -> [B, 1]."""
    w1a_t, w1b_t, b1, w2, b2 = params
    B, obs_size = obs.shape
    cmd_size = cmd.shape[1]
    H = w1a_t.shape[0]

    # Cast MXU operands (activations AND layer-1 weight halves together) to the
    # low-precision compute dtype; everything post-MXU stays f32.
    obs_c = obs.astype(compute_dtype)
    cmd_c = cmd.astype(compute_dtype)
    w1a_c = w1a_t.astype(compute_dtype)
    w1b_c = w1b_t.astype(compute_dtype)
    b1_c = b1.astype(jnp.float32).reshape(H, 1)
    w2_c = w2.astype(jnp.float32).reshape(H, 1)
    b2_c = b2.astype(jnp.float32).reshape(1, 1)

    # Small-batch fallback: below ~one well-sized tile, dispatch + fixed
    # pipeline overhead dominates anything the kernel controls; let XLA fuse.
    if B < min_pallas_batch:
        h = (jnp.dot(obs_c, w1a_c.T, preferred_element_type=jnp.float32)
             + jnp.dot(cmd_c, w1b_c.T, preferred_element_type=jnp.float32))
        h = jnp.maximum(h + b1_c.reshape(1, -1), 0.0)
        return jnp.sum(h * w2_c.reshape(1, -1), axis=1,
                       keepdims=True) + b2_c[0, 0]

    # ---- Pallas path: generation-aware batch tiling -------------------------
    itemsize = jnp.dtype(compute_dtype).itemsize
    pad_l = lambda n: _round_up(n, 128)
    # Per-row VMEM working-set estimate: double-buffered, lane-padded obs/cmd
    # tiles + the [H, tb] f32 layer-1 slab (x2 headroom for a second
    # temporary) + double-buffered [1, tb] f32 output slab.
    bytes_per_row = (2 * (pad_l(obs_size) + pad_l(cmd_size)) * itemsize
                     + 2 * H * 4
                     + 2 * 4)
    cap_rows = max(128, (vmem_working_budget // bytes_per_row) // 128 * 128)

    # Force >= min_grid_steps grid steps so a 2-TC chip (v7x) shards the grid
    # and each core still pipelines; lane-dense output needs tb % 128 == 0.
    tb = max(128, min(block_b, cap_rows,
                      _round_up(pl.cdiv(B, min_grid_steps), 128)))
    tb = _round_up(tb, 128)
    b_pad = _round_up(B, tb)

    if b_pad != B:
        obs_c = jnp.pad(obs_c, ((0, b_pad - B), (0, 0)))
        cmd_c = jnp.pad(cmd_c, ((0, b_pad - B), (0, 0)))

    weights_bytes = (H * (pad_l(obs_size) + pad_l(cmd_size)) * itemsize
                     + 4 * H * 4)
    # Explicit scoped-VMEM limit: generous margin over the estimate, capped at
    # 48 MiB so it stays inside v7x's 64 MiB-per-TC physical VMEM.
    vmem_limit = int(min(48 << 20,
                         max(24 << 20,
                             2 * bytes_per_row * tb + weights_bytes + (4 << 20))))

    const = lambda i: (0, 0)
    q_lane = pl.pallas_call(
        dqn_linear_kernel,
        out_shape=jax.ShapeDtypeStruct((1, b_pad), jnp.float32),
        grid=(b_pad // tb,),
        in_specs=[
            pl.BlockSpec((tb, obs_size), lambda i: (i, 0)),      # obs tile (streamed)
            pl.BlockSpec((tb, cmd_size), lambda i: (i, 0)),      # cmd tile (streamed)
            pl.BlockSpec((H, obs_size), const),                  # W1a (resident)
            pl.BlockSpec((H, cmd_size), const),                  # W1b (resident)
            pl.BlockSpec((H, 1), const),                         # b1 column
            pl.BlockSpec((H, 1), const),                         # w2 column
            pl.BlockSpec(memory_space=pltpu.MemorySpace.SMEM),   # b2 scalar
        ],
        out_specs=pl.BlockSpec((1, tb), lambda i: (0, i)),       # lane-dense out
        compiler_params=pltpu.CompilerParams(
            dimension_semantics=("parallel",),   # megacore / v7x 2-TC sharding
            vmem_limit_bytes=vmem_limit,
        ),
    )(obs_c, cmd_c, w1a_c, w1b_c, b1_c, w2_c, b2_c)

    # Padded batch rows are NOT zero (ReLU(b1)·w2 + b2); they are sliced off
    # here — never consume the padded [1, b_pad] buffer directly downstream.
    return q_lane[0, :B].reshape(B, 1)


def init_params(key, obs_size, cmd_size, hid_size):
    """Deterministic synthetic params in the kernel-native layout.

    torch.nn.Linear(obs+cmd, hid): weight [hid, obs+cmd], bias [hid]
        -> split along the input dim as w1a_t [hid, obs], w1b_t [hid, cmd]
           (kernel computes W @ x^T directly), bias as a [hid, 1] column.
    torch.nn.Linear(hid, 1): weight [1, hid] -> column [hid, 1],
        bias [1] -> (1, 1) scalar (lives in SMEM).
    """
    k1, k2, k3, k4, k5 = jax.random.split(key, 5)
    w1a_t = jax.random.normal(k1, (hid_size, obs_size), jnp.float32) * 0.05
    w1b_t = jax.random.normal(k2, (hid_size, cmd_size), jnp.float32) * 0.05
    b1 = jax.random.normal(k3, (hid_size, 1), jnp.float32) * 0.05
    w2 = jax.random.normal(k4, (hid_size, 1), jnp.float32) * 0.05
    b2 = jax.random.normal(k5, (1, 1), jnp.float32) * 0.05
    return w1a_t, w1b_t, b1, w2, b2


def _reference(obs, cmd, params, compute_dtype):
    """Pure-JAX reference of the same math (cat -> Linear -> ReLU -> Linear),
    with the same bf16-operand / f32-accumulation matmul and an f32 epilogue.
    (Bit-parity with a full-f32 PyTorch reference would need f32 / HIGHEST
    precision matmuls; tolerance below reflects the bf16 MXU path.)"""
    w1a_t, w1b_t, b1, w2, b2 = params
    cd = compute_dtype
    h = (jnp.dot(obs.astype(cd), w1a_t.astype(cd).T,
                 preferred_element_type=jnp.float32)
         + jnp.dot(cmd.astype(cd), w1b_t.astype(cd).T,
                   preferred_element_type=jnp.float32))
    h = jnp.maximum(h + b1.reshape(1, -1), 0.0)
    return jnp.sum(h * w2.reshape(1, -1), axis=1, keepdims=True) + b2[0, 0]


if __name__ == "__main__":
    key = jax.random.PRNGKey(0)
    # hid_size=128 keeps the hidden dim a full lane width at small test scale.
    obs_size, cmd_size, hid_size = 32, 16, 128
    batch = 8

    k_obs, k_cmd, k_params, k_obs2, k_cmd2 = jax.random.split(key, 5)
    obs = jax.random.normal(k_obs, (batch, obs_size), jnp.float32)
    cmd = jax.random.normal(k_cmd, (batch, cmd_size), jnp.float32)
    params = init_params(k_params, obs_size, cmd_size, hid_size)
    ref = _reference(obs, cmd, params, jnp.bfloat16)

    # 1) Small batch forced through the Pallas kernel (single 128-row tile).
    q = dqn_linear_forward(obs, cmd, params, min_pallas_batch=0)
    jax.block_until_ready(q)
    assert q.shape == (batch, 1)
    assert jnp.allclose(q, ref, atol=2e-3, rtol=2e-3), "Pallas path mismatch"

    # 2) Same batch through the small-batch XLA fallback (default threshold).
    q_fb = dqn_linear_forward(obs, cmd, params)
    jax.block_until_ready(q_fb)
    assert jnp.allclose(q_fb, ref, atol=2e-3, rtol=2e-3), "fallback mismatch"

    # 3) Multi-tile Pallas path: batch padded to 384, grid of 3 parallel steps.
    batch2 = 300
    obs2 = jax.random.normal(k_obs2, (batch2, obs_size), jnp.float32)
    cmd2 = jax.random.normal(k_cmd2, (batch2, cmd_size), jnp.float32)
    q2 = dqn_linear_forward(obs2, cmd2, params, min_pallas_batch=0, block_b=128)
    jax.block_until_ready(q2)
    ref2 = _reference(obs2, cmd2, params, jnp.bfloat16)
    assert q2.shape == (batch2, 1)
    assert jnp.allclose(q2, ref2, atol=2e-3, rtol=2e-3), "multi-tile mismatch"

    print("KERNEL_OK")
</pallas_src>

<mosaic_0001>
module attributes {stable_mosaic.version = 11 : i64} {
  func.func @dqn_linear_kernel(%arg0: i32, %arg1: memref<128x32xbf16, #tpu.memory_space<vmem>>, %arg2: memref<128x16xbf16, #tpu.memory_space<vmem>>, %arg3: memref<128x32xbf16, #tpu.memory_space<vmem>>, %arg4: memref<128x16xbf16, #tpu.memory_space<vmem>>, %arg5: memref<128x1xf32, #tpu.memory_space<vmem>>, %arg6: memref<128x1xf32, #tpu.memory_space<vmem>>, %arg7: memref<1x1xf32, #tpu.memory_space<smem>>, %arg8: memref<1x128xf32, #tpu.memory_space<vmem>>) attributes {dimension_semantics = [#tpu.dimension_semantics<parallel>], iteration_bounds = array<i64: 1>, scalar_prefetch = 0 : i64, scratch_operands = 0 : i64, tpu.core_type = #tpu.core_type<tc>, window_params = [{transform_indices = @transform_0, window_bounds = array<i64: 128, 32>}, {transform_indices = @transform_1, window_bounds = array<i64: 128, 16>}, {pipeline_mode = #tpu.pipeline_mode<synchronous>, transform_indices = @transform_2, window_bounds = array<i64: 128, 32>}, {pipeline_mode = #tpu.pipeline_mode<synchronous>, transform_indices = @transform_3, window_bounds = array<i64: 128, 16>}, {pipeline_mode = #tpu.pipeline_mode<synchronous>, transform_indices = @transform_4, window_bounds = array<i64: 128, 1>}, {pipeline_mode = #tpu.pipeline_mode<synchronous>, transform_indices = @transform_5, window_bounds = array<i64: 128, 1>}, {transform_indices = @transform_6, window_bounds = array<i64: 1, 1>}, {transform_indices = @transform_7, window_bounds = array<i64: 1, 128>}]} {
    %c0 = arith.constant 0 : index
    %c0_0 = arith.constant 0 : index
    %0 = vector.load %arg1[%c0, %c0_0] : memref<128x32xbf16, #tpu.memory_space<vmem>>, vector<128x32xbf16>
    %c0_1 = arith.constant 0 : index
    %c0_2 = arith.constant 0 : index
    %1 = vector.load %arg2[%c0_1, %c0_2] : memref<128x16xbf16, #tpu.memory_space<vmem>>, vector<128x16xbf16>
    %c0_3 = arith.constant 0 : index
    %c0_4 = arith.constant 0 : index
    %2 = vector.load %arg3[%c0_3, %c0_4] : memref<128x32xbf16, #tpu.memory_space<vmem>>, vector<128x32xbf16>
    %cst = arith.constant dense<0.000000e+00> : vector<128x128xf32>
    %3 = tpu.matmul %2, %0, %cst {dimension_numbers = #tpu.dot_dimension_numbers<[1], [1], [0], [0], [0, 0, 1, 0], [], []>} : vector<128x32xbf16>, vector<128x32xbf16>, vector<128x128xf32> -> vector<128x128xf32>
    %c0_5 = arith.constant 0 : index
    %c0_6 = arith.constant 0 : index
    %4 = vector.load %arg4[%c0_5, %c0_6] : memref<128x16xbf16, #tpu.memory_space<vmem>>, vector<128x16xbf16>
    %cst_7 = arith.constant dense<0.000000e+00> : vector<128x128xf32>
    %5 = tpu.matmul %4, %1, %cst_7 {dimension_numbers = #tpu.dot_dimension_numbers<[1], [1], [0], [0], [0, 0, 1, 0], [], []>} : vector<128x16xbf16>, vector<128x16xbf16>, vector<128x128xf32> -> vector<128x128xf32>
    %6 = arith.addf %3, %5 : vector<128x128xf32>
    %c0_8 = arith.constant 0 : index
    %c0_9 = arith.constant 0 : index
    %7 = vector.load %arg5[%c0_8, %c0_9] : memref<128x1xf32, #tpu.memory_space<vmem>>, vector<128x1xf32>
    %8 = vector.broadcast %7 : vector<128x1xf32> to vector<128x128xf32>
    %9 = arith.addf %6, %8 : vector<128x128xf32>
    %cst_10 = arith.constant 0.000000e+00 : f32
    %10 = vector.broadcast %cst_10 : f32 to vector<128x128xf32>
    %11 = arith.maximumf %9, %10 : vector<128x128xf32>
    %c0_11 = arith.constant 0 : index
    %c0_12 = arith.constant 0 : index
    %12 = vector.load %arg6[%c0_11, %c0_12] : memref<128x1xf32, #tpu.memory_space<vmem>>, vector<128x1xf32>
    %13 = vector.broadcast %12 : vector<128x1xf32> to vector<128x128xf32>
    %14 = arith.mulf %11, %13 : vector<128x128xf32>
    %cst_13 = arith.constant dense<0.000000e+00> : vector<128xf32>
    %15 = vector.multi_reduction <add>, %14, %cst_13 [0] : vector<128x128xf32> to vector<128xf32>
    %16 = vector.shape_cast %15 : vector<128xf32> to vector<1x128xf32>
    %c0_14 = arith.constant 0 : index
    %c0_15 = arith.constant 0 : index
    %17 = memref.load %arg7[%c0_14, %c0_15] : memref<1x1xf32, #tpu.memory_space<smem>>
    %18 = vector.broadcast %17 : f32 to vector<1x128xf32>
    %19 = arith.addf %16, %18 : vector<1x128xf32>
    %c0_16 = arith.constant 0 : index
    %c0_17 = arith.constant 0 : index
    %20 = vector.load %arg8[%c0_16, %c0_17] : memref<1x128xf32, #tpu.memory_space<vmem>>, vector<1x128xf32>
    tpu.vector_store %arg8[%c0_16, %c0_17], %19 {strides = array<i32>} : memref<1x128xf32, #tpu.memory_space<vmem>>, vector<1x128xf32>,
    return
  }
  func.func @transform_0(%arg0: i32) -> (i32, i32) {
    %c0_i32 = arith.constant 0 : i32
    %c0_i32_0 = arith.constant 0 : i32
    return %arg0, %c0_i32 : i32, i32
  }
  func.func @transform_1(%arg0: i32) -> (i32, i32) {
    %c0_i32 = arith.constant 0 : i32
    %c0_i32_0 = arith.constant 0 : i32
    return %arg0, %c0_i32 : i32, i32
  }
  func.func @transform_2(%arg0: i32) -> (i32, i32) {
    %c0_i32 = arith.constant 0 : i32
    %c0_i32_0 = arith.constant 0 : i32
    %c0_i32_1 = arith.constant 0 : i32
    return %c0_i32, %c0_i32_0 : i32, i32
  }
  func.func @transform_3(%arg0: i32) -> (i32, i32) {
    %c0_i32 = arith.constant 0 : i32
    %c0_i32_0 = arith.constant 0 : i32
    %c0_i32_1 = arith.constant 0 : i32
    return %c0_i32, %c0_i32_0 : i32, i32
  }
  func.func @transform_4(%arg0: i32) -> (i32, i32) {
    %c0_i32 = arith.constant 0 : i32
    %c0_i32_0 = arith.constant 0 : i32
    %c0_i32_1 = arith.constant 0 : i32
    return %c0_i32, %c0_i32_0 : i32, i32
  }
  func.func @transform_5(%arg0: i32) -> (i32, i32) {
    %c0_i32 = arith.constant 0 : i32
    %c0_i32_0 = arith.constant 0 : i32
    %c0_i32_1 = arith.constant 0 : i32
    return %c0_i32, %c0_i32_0 : i32, i32
  }
  func.func @transform_6(%arg0: i32) -> (i32, i32) {
    %c0_i32 = arith.constant 0 : i32
    %c0_i32_0 = arith.constant 0 : i32
    %c0_i32_1 = arith.constant 0 : i32
    return %c0_i32, %c0_i32_0 : i32, i32
  }
  func.func @transform_7(%arg0: i32) -> (i32, i32) {
    %c0_i32 = arith.constant 0 : i32
    %c0_i32_0 = arith.constant 0 : i32
    return %c0_i32, %arg0 : i32, i32
  }
}

</mosaic_0001>

<bundles_post_ra>
// kernel: tpu_custom_call.1
= control target key start
LH: loop header
LB: loop body
LE: loop exit
PB: predicated region body
PF: predicated region fallthrough
CT: control target
= control target key end

     0   :  { %vm173_vm0 = vcmask 130048   ;;  %vm399_vm1 = vcmask 261120   ;;  %v1060_v16 = vmov 0   ;;  %s1393_s0 = inlined_call_operand.vmem [shape: bf16[128,32], index: 0, kind: input, shape index: {}]   ;;  %s1394_s1 = inlined_call_operand.vmem [shape: bf16[128,16], index: 1, kind: input, shape index: {}]   ;;  %s1395_s2 = inlined_call_operand.vmem [shape: bf16[128,32], index: 2, kind: input, shape index: {}]   ;;  %s1396_s3 = inlined_call_operand.vmem [shape: bf16[128,16], index: 3, kind: input, shape index: {}]   ;;  %s1397_s4 = inlined_call_operand.vmem [shape: f32[128,1], index: 4, kind: input, shape index: {}]   ;;  %s1398_s5 = inlined_call_operand.vmem [shape: f32[128,1], index: 5, kind: input, shape index: {}]   ;;  %s1399_s6 = inlined_call_operand.<no memory space> [shape: f32[1,1], index: 6, kind: input, shape index: {}]   ;;  %s1400_s7 = inlined_call_operand.hbm [shape: f32[1,128], index: 7, kind: output, shape index: {}]  }
   0x1   :  { %v1004_v0 = vld [vmem:[%s1394_s1] sm:$0xff]   ;;  %v1006_v3 = vld [vmem:[%s1394_s1 + $0x8] sm:$0xff]   ;;  %v1008_v7 = vld [vmem:[%s1394_s1 + $0x10] sm:$0xff]   ;;  %1002 = vset.pattern.permute.xlu0 %v1060_v16  ;;  %1003 = vset.pattern.permute.xlu1 %v1060_v16 }
   0x2   :  { %v1005_v1 = vld [vmem:[%s1393_s0] sm:$0xff]   ;;  %984 = vmatprep.subr.msk.bf16.mxu1 %vm173_vm0, %v1004_v0  ;;  %v199_v2 = vsel %vm173_vm0, %v1004_v0, 0  ;;  %v1007_v5 = vld [vmem:[%s1393_s0 + $0x8] sm:$0xff]   ;;  %v202_v6 = vsel %vm173_vm0, %v1006_v3, 0  ;;  %v1009_v9 = vld [vmem:[%s1393_s0 + $0x10] sm:$0xff]   ;;  %v205_v12 = vsel %vm173_vm0, %v1008_v7, 0 }
   0x3   :  { %992 = vmatprep.subr.msk.bf16.mxu0 %vm399_vm1, %v1005_v1  ;;  %905 = vmatpush3.bf16.xpose.msra.mxu1 %v199_v2  ;;  %v425_v4 = vsel %vm399_vm1, %v1005_v1, 0  ;;  %v428_v8 = vsel %vm399_vm1, %v1007_v5, 0  ;;  %v1010_v10 = vld [vmem:[%s1394_s1 + $0x18] sm:$0xff]   ;;  %v545_v13 = vld [vmem:[%s1397_s4] sm:$0xff]  ;;  %v431_v15 = vsel %vm399_vm1, %v1009_v9, 0  ;;  %v547_v18 = vld [vmem:[%s1397_s4 + $0x10] sm:$0xff] }
   0x4   :  { %937 = vmatpush3.bf16.xpose.msra.mxu0 %v425_v4  ;;  %985 = vmatprep.subr.msk.bf16.mxu1 %vm173_vm0, %v1006_v3  ;;  %v1011_v11 = vld [vmem:[%s1393_s0 + $0x18] sm:$0xff]   ;;  %v1020_v14 = vld [vmem:[%s1396_s3] sm:$0xff]   ;;  %v546_v19 = vld [vmem:[%s1397_s4 + $0x8] sm:$0xff]  ;;  %v208_v22 = vsel %vm173_vm0, %v1010_v10, 0 }
   0x5   :  { %993 = vmatprep.subr.msk.bf16.mxu0 %vm399_vm1, %v1007_v5  ;;  %v1021_v17 = vld [vmem:[%s1395_s2] sm:$0xff]   ;;  %563 = vperm.xlu0 %1002, %v545_v13   ;;  %v548_v20 = vld [vmem:[%s1397_s4 + $0x18] sm:$0xff]  ;;  %v434_v24 = vsel %vm399_vm1, %v1011_v11, 0  ;;  %v674_v26 = vld [vmem:[%s1398_s5 + $0x8] sm:$0xff] }
   0x6   :  { %920 = vmatprep.mubr.msk.bf16.mxu1 %vm173_vm0, %v1020_v14  ;;  %952 = vmatprep.mubr.msk.bf16.mxu0 %vm399_vm1, %v1021_v17  ;;  %v673_v21 = vld [vmem:[%s1398_s5] sm:$0xff]  ;;  %v675_v28 = vld [vmem:[%s1398_s5 + $0x10] sm:$0xff]  ;;  %v550_v29 = vld [vmem:[%s1397_s4 + $0x28] sm:$0xff] }
   0x7   :  { %573 = vperm.xlu1 %1003, %v547_v18   ;;  %v1012_v23 = vld [vmem:[%s1394_s1 + $0x20] sm:$0xff]   ;;  %v1014_v31 = vld [vmem:[%s1394_s1 + $0x28] sm:$0xff]   ;;  %v676_v34 = vld [vmem:[%s1398_s5 + $0x18] sm:$0xff] }
   0x8   :  { %v1013_v25 = vld [vmem:[%s1393_s0 + $0x20] sm:$0xff]   ;;  %v211_v30 = vsel %vm173_vm0, %v1012_v23, 0  ;;  %v1015_v33 = vld [vmem:[%s1393_s0 + $0x28] sm:$0xff]   ;;  %v551_v35 = vld [vmem:[%s1397_s4 + $0x30] sm:$0xff]  ;;  %v214_v38 = vsel %vm173_vm0, %v1014_v31, 0 }
   0x9   :  { %568 = vperm.xlu0 %1002, %v546_v19   ;;  %v549_v27 = vld [vmem:[%s1397_s4 + $0x20] sm:$0xff]  ;;  %v437_v32 = vsel %vm399_vm1, %v1013_v25, 0  ;;  %v552_v37 = vld [vmem:[%s1397_s4 + $0x38] sm:$0xff]  ;;  %v1016_v39 = vld [vmem:[%s1394_s1 + $0x30] sm:$0xff]   ;;  %v440_v40 = vsel %vm399_vm1, %v1015_v33, 0 }
   0xa   :  { %v677_v36 = vld [vmem:[%s1398_s5 + $0x20] sm:$0xff]  ;;  %v1017_v41 = vld [vmem:[%s1393_s0 + $0x30] sm:$0xff]   ;;  %v678_v42 = vld [vmem:[%s1398_s5 + $0x28] sm:$0xff] }
   0xb   :  { %907 = vmatpush3.bf16.xpose.msra.mxu1 %v202_v6  ;;  %578 = vperm.xlu1 %1003, %v548_v20  }
   0xc   :  { %939 = vmatpush3.bf16.xpose.msra.mxu0 %v428_v8  ;;  %986 = vmatprep.subr.msk.bf16.mxu1 %vm173_vm0, %v1008_v7 }
   0xd   :  { %994 = vmatprep.subr.msk.bf16.mxu0 %vm399_vm1, %v1009_v9  ;;  %691 = vperm.xlu0 %1002, %v673_v21  }
   0xf   :  { %696 = vperm.xlu1 %1003, %v674_v26  }
  0x11   :  { %583 = vperm.xlu0 %1002, %v549_v27  }
  0x13   :  { %909 = vmatpush3.bf16.xpose.msra.mxu1 %v205_v12  ;;  %701 = vperm.xlu1 %1003, %v675_v28  }
  0x14   :  { %941 = vmatpush3.bf16.xpose.msra.mxu0 %v431_v15  ;;  %987 = vmatprep.subr.msk.bf16.mxu1 %vm173_vm0, %v1010_v10 }
  0x15   :  { %995 = vmatprep.subr.msk.bf16.mxu0 %vm399_vm1, %v1011_v11  ;;  %588 = vperm.xlu0 %1002, %v550_v29  }
  0x17   :  { %706 = vperm.xlu1 %1003, %v676_v34  }
  0x19   :  { %593 = vperm.xlu0 %1002, %v551_v35  }
  0x1b   :  { %911 = vmatpush3.bf16.xpose.msra.mxu1 %v208_v22  ;;  %711 = vperm.xlu1 %1003, %v677_v36  }
  0x1c   :  { %943 = vmatpush3.bf16.xpose.msra.mxu0 %v434_v24  ;;  %988 = vmatprep.subr.msk.bf16.mxu1 %vm173_vm0, %v1012_v23 }
  0x1d   :  { %996 = vmatprep.subr.msk.bf16.mxu0 %vm399_vm1, %v1013_v25  ;;  %598 = vperm.xlu0 %1002, %v552_v37  }
  0x23   :  { %913 = vmatpush3.bf16.xpose.msra.mxu1 %v211_v30 }
  0x24   :  { %945 = vmatpush3.bf16.xpose.msra.mxu0 %v437_v32  ;;  %989 = vmatprep.subr.msk.bf16.mxu1 %vm173_vm0, %v1014_v31 }
  0x25   :  { %997 = vmatprep.subr.msk.bf16.mxu0 %vm399_vm1, %v1015_v33 }
  0x26   :  { %13 = vsyncpa [#allocation4], 0  ;;  %v553_v43 = vld [vmem:[%s1397_s4 + $0x40] sm:$0xff]  ;;  %716 = vperm.xlu1 %1003, %v678_v42   ;;  %v679_v44 = vld [vmem:[%s1398_s5 + $0x30] sm:$0xff]  ;;  %v217_v46 = vsel %vm173_vm0, %v1016_v39, 0  ;;  %v443_v48 = vsel %vm399_vm1, %v1017_v41, 0 }
  0x27   :  { %603 = vperm.xlu0 %1002, %v553_v43   ;;  %v554_v45 = vld [vmem:[%s1397_s4 + $0x48] sm:$0xff]  ;;  %v1018_v47 = vld [vmem:[%s1394_s1 + $0x38] sm:$0xff]   ;;  %v555_v51 = vld [vmem:[%s1397_s4 + $0x50] sm:$0xff]  ;;  %s1061_s29 = smov [#allocation3]  }
  0x28   :  { %v1019_v49 = vld [vmem:[%s1393_s0 + $0x38] sm:$0xff]   ;;  %v681_v52 = vld [vmem:[%s1398_s5 + $0x40] sm:$0xff]  ;;  %v220_v54 = vsel %vm173_vm0, %v1018_v47, 0  ;;  %v682_v56 = vld [vmem:[%s1398_s5 + $0x48] sm:$0xff]  ;;  %s816_s30 = sshll.u32 %s1061_s29, 4  ;;  %s817_s30 = int_to_ptr.vmem [resolvable:$true] %s816_s30 }
  0x29   :  { %v680_v50 = vld [vmem:[%s1398_s5 + $0x38] sm:$0xff]  ;;  %v446_v55 = vsel %vm399_vm1, %v1019_v49, 0  ;;  %v557_v57 = vld [vmem:[%s1397_s4 + $0x60] sm:$0xff]  ;;  %v1022_v58 = vld [vmem:[%s1396_s3 + $0x8] sm:$0xff]   ;;  %s1036_s8 = scalar_lea.vmem %s817_s30, 16  ;;  %s1040_s9 = scalar_lea.vmem %s817_s30, 32 }
  0x2a   :  { %721 = vperm.xlu1 %1003, %v679_v44   ;;  %v556_v53 = vld [vmem:[%s1397_s4 + $0x58] sm:$0xff]  ;;  %v683_v59 = vld [vmem:[%s1398_s5 + $0x50] sm:$0xff]  ;;  %v1023_v60 = vld [vmem:[%s1395_s2 + $0x8] sm:$0xff]   ;;  %p1037_p0 = scmp.ne.s32.totalorder %s817_s30, %s1036_s8  ;;  %p1041_p1 = scmp.lt.s32.totalorder %s817_s30, %s817_s30 }
  0x2b   :  { %915 = vmatpush3.bf16.xpose.msra.mxu1 %v214_v38  ;;  %608 = vperm.xlu0 %1002, %v554_v45   ;;  %v1024_v61 = vld [vmem:[%s1396_s3 + $0x10] sm:$0xff]   ;;  %v558_v62 = vld [vmem:[%s1397_s4 + $0x68] sm:$0xff]  ;;  %v684_v0 = vld [vmem:[%s1398_s5 + $0x58] sm:$0xff]  ;;  %p1042_p2 = scmp.lt.s32.totalorder %s1040_s9, %s1036_s8 }
  0x2c   :  { %947 = vmatpush3.bf16.xpose.msra.mxu0 %v440_v40  ;;  %990 = vmatprep.subr.msk.bf16.mxu1 %vm173_vm0, %v1016_v39  ;;  %v1025_v63 = vld [vmem:[%s1395_s2 + $0x10] sm:$0xff]   ;;  %v1026_v2 = vld [vmem:[%s1396_s3 + $0x18] sm:$0xff]   ;;  %v685_v3 = vld [vmem:[%s1398_s5 + $0x60] sm:$0xff] }
  0x2d   :  { %998 = vmatprep.subr.msk.bf16.mxu0 %vm399_vm1, %v1017_v41  ;;  %v559_v1 = vld [vmem:[%s1397_s4 + $0x70] sm:$0xff]  ;;  %v1027_v4 = vld [vmem:[%s1395_s2 + $0x18] sm:$0xff]   ;;  %v1028_v5 = vld [vmem:[%s1396_s3 + $0x20] sm:$0xff]   ;;  %p1043_p3 = por %p1042_p2, %p1041_p1 }
  0x2e   :  { %726 = vperm.xlu1 %1003, %v680_v50   ;;  %v560_v6 = vld [vmem:[%s1397_s4 + $0x78] sm:$0xff]  ;;  %v1029_v7 = vld [vmem:[%s1395_s2 + $0x20] sm:$0xff]   ;;  %v686_v8 = vld [vmem:[%s1398_s5 + $0x68] sm:$0xff] }
  0x2f   :  { %613 = vperm.xlu0 %1002, %v555_v51   ;;  %v687_v9 = vld [vmem:[%s1398_s5 + $0x70] sm:$0xff]  ;;  %v1030_v10 = vld [vmem:[%s1396_s3 + $0x28] sm:$0xff]   ;;  %v688_v11 = vld [vmem:[%s1398_s5 + $0x78] sm:$0xff]  ;;  %p1044_p4 = pnand %p1043_p3, %p1037_p0 }
  0x30   :  { %v1031_v12 = vld [vmem:[%s1395_s2 + $0x28] sm:$0xff]   ;;  %v1032_v13 = vld [vmem:[%s1396_s3 + $0x30] sm:$0xff]   ;;  %v1034_v15 = vld [vmem:[%s1396_s3 + $0x38] sm:$0xff]  }
  0x31   :  { %v1033_v14 = vld [vmem:[%s1395_s2 + $0x30] sm:$0xff]   ;;  %v1035_v16 = vld [vmem:[%s1395_s2 + $0x38] sm:$0xff]  }
  0x32   :  { %731 = vperm.xlu1 %1003, %v681_v52  }
  0x33   :  { %917 = vmatpush3.bf16.xpose.msra.mxu1 %v217_v46  ;;  %618 = vperm.xlu0 %1002, %v556_v53  }
  0x34   :  { %949 = vmatpush3.bf16.xpose.msra.mxu0 %v443_v48  ;;  %991 = vmatprep.subr.msk.bf16.mxu1 %vm173_vm0, %v1018_v47 }
  0x35   :  { %999 = vmatprep.subr.msk.bf16.mxu0 %vm399_vm1, %v1019_v49 }
  0x36   :  { %736 = vperm.xlu1 %1003, %v682_v56  }
  0x37   :  { %623 = vperm.xlu0 %1002, %v557_v57  }
  0x3a   :  { %741 = vperm.xlu1 %1003, %v683_v59  }
  0x3b   :  { %919 = vmatpush3.bf16.xpose.msra.mxu1 %v220_v54  ;;  %628 = vperm.xlu0 %1002, %v558_v62  }
  0x3c   :  { %951 = vmatpush3.bf16.xpose.msra.mxu0 %v446_v55 }
  0x3e   :  { %746 = vperm.xlu1 %1003, %v684_v0  }
  0x3f   :  { %633 = vperm.xlu0 %1002, %v559_v1  }
  0x42   :  { %921 = vmatmul.mubr.msk.bf16.vlgmr.msra.gmra.mrb[0].mxu1 %vm173_vm0, %v1022_v58  ;;  %751 = vperm.xlu1 %1003, %v685_v3  }
  0x43   :  { %953 = vmatmul.mubr.msk.bf16.vlgmr.msra.gmra.mrb[0].mxu0 %vm399_vm1, %v1023_v60  ;;  %924 = vmatprep.mubr.msk.bf16.mxu1 %vm173_vm0, %v1024_v61 }
  0x44   :  { %956 = vmatprep.mubr.msk.bf16.mxu0 %vm399_vm1, %v1025_v63  ;;  %638 = vperm.xlu0 %1002, %v560_v6  }
  0x46   :  { %756 = vperm.xlu1 %1003, %v686_v8  }
  0x48   :  { %761 = vperm.xlu0 %1002, %v687_v9  }
  0x4a   :  { %925 = vmatmul.mubr.msk.bf16.gmra.mrb[4].mxu1 %vm173_vm0, %v1026_v2  ;;  %766 = vperm.xlu1 %1003, %v688_v11  }
  0x4b   :  { %957 = vmatmul.mubr.msk.bf16.gmra.mrb[4].mxu0 %vm399_vm1, %v1027_v4  ;;  %928 = vmatprep.mubr.msk.bf16.mxu1 %vm173_vm0, %v1028_v5 }
  0x4c   :  { %960 = vmatprep.mubr.msk.bf16.mxu0 %vm399_vm1, %v1029_v7 }
  0x52   :  { %929 = vmatmul.mubr.msk.bf16.gmra.mrb[8].mxu1 %vm173_vm0, %v1030_v10 }
  0x53   :  { %961 = vmatmul.mubr.msk.bf16.gmra.mrb[8].mxu0 %vm399_vm1, %v1031_v12  ;;  %932 = vmatprep.mubr.msk.bf16.mxu1 %vm173_vm0, %v1032_v13 }
  0x54   :  { %964 = vmatprep.mubr.msk.bf16.mxu0 %vm399_vm1, %v1033_v14 }
  0x5a   :  { %933 = vmatmul.mubr.msk.bf16.gmra.mrb[12].mxu1 %vm173_vm0, %v1034_v15 }
  0x5b   :  { %965 = vmatmul.mubr.msk.bf16.gmra.mrb[12].mxu0 %vm399_vm1, %v1035_v16 }
  0x84   :  { %v564_v17 = vpop.permute.xlu0 %563 }
  0x86   :  { %v574_v18 = vpop.permute.xlu1 %573 }
  0x88   :  { %v569_v19 = vpop.permute.xlu0 %568 }
  0x8a   :  { %v579_v20 = vpop.permute.xlu1 %578 }
  0x8c   :  { %v692_v21 = vpop.permute.xlu0 %691 }
  0x8e   :  { %v697_v22 = vpop.permute.xlu1 %696 }
  0x90   :  { %v584_v23 = vpop.permute.xlu0 %583 }
  0x92   :  { %v702_v24 = vpop.permute.xlu1 %701 }
  0x94   :  { %v589_v25 = vpop.permute.xlu0 %588 }
  0x96   :  { %v707_v26 = vpop.permute.xlu1 %706 }
  0x98   :  { %v594_v27 = vpop.permute.xlu0 %593 }
  0x9a   :  { %v712_v28 = vpop.permute.xlu1 %711 }
  0x9c   :  { %v599_v29 = vpop.permute.xlu0 %598 }
  0xa5   :  { %v1342_v30 = vpop.permute.xlu1 %716 }
  0xa6   :  { %v1344_v31 = vpop.permute.xlu0 %603 }
  0xa9   :  { %v1346_v32 = vpop.permute.xlu1 %721 }
  0xaa   :  { %v1348_v33 = vpop.permute.xlu0 %608 }
  0xad   :  { %v1350_v34 = vpop.permute.xlu1 %726 }
  0xae   :  { %v1352_v35 = vpop.permute.xlu0 %613 }
  0xb1   :  { %v1354_v36 = vpop.permute.xlu1 %731 }
  0xb2   :  { %v1356_v37 = vpop.permute.xlu0 %618 }
  0xb5   :  { %v1358_v38 = vpop.permute.xlu1 %736 }
  0xb6   :  { %v1360_v54 = vpop.permute.xlu0 %623 }
  0xb9   :  { %v1362_v57 = vpop.permute.xlu1 %741 }
  0xba   :  { %v1364_v16 = vpop.permute.xlu0 %628 }
 0x115   :  { %v922_v39 = vpop.f32.mrb[0].mxu1 }
 0x116   :  { %v954_v40 = vpop.f32.mrb[0].mxu0  ;;  %v256_v41 = vpop.f32.mrb[1].mxu1 }
 0x117   :  { %v491_v42 = vadd.f32 %v954_v40, %v922_v39  ;;  %v482_v43 = vpop.f32.mrb[1].mxu0  ;;  %v923_v44 = vpop.f32.mrb[2].mxu1 }
 0x118   :  { %v483_v45 = vadd.f32 %v482_v43, %v256_v41  ;;  %v955_v46 = vpop.f32.mrb[2].mxu0  ;;  %v259_v47 = vpop.f32.mrb[3].mxu1 }
 0x119   :  { %v643_v48 = vadd.f32 %v574_v18, %v491_v42  ;;  %v494_v49 = vadd.f32 %v955_v46, %v923_v44  ;;  %v485_v50 = vpop.f32.mrb[3].mxu0  ;;  %v747_v39 = vpop.permute.xlu1 %746 }
 0x11a   :  { %v641_v51 = vadd.f32 %v564_v17, %v483_v45  ;;  %v486_v52 = vadd.f32 %v485_v50, %v259_v47 }
 0x11b   :  { %v644_v53 = vadd.f32 %v579_v20, %v494_v49  ;;  %v659_v58 = vmax.f32 %v643_v48, 0.0 }
 0x11c   :  { %v657_v55 = vmax.f32 %v641_v51, 0.0  ;;  %v642_v56 = vadd.f32 %v569_v19, %v486_v52 }
 0x11d   :  { %v926_v59 = vpop.f32.mrb[4].mxu1  ;;  %v660_v63 = vmax.f32 %v644_v53, 0.0  ;;  %v771_v8 = vmul.f32 %v702_v24, %v659_v58 }
 0x11e   :  { %v658_v60 = vmax.f32 %v642_v56, 0.0  ;;  %v958_v61 = vpop.f32.mrb[4].mxu0  ;;  %v272_v62 = vpop.f32.mrb[5].mxu1  ;;  %v769_v3 = vmul.f32 %v692_v21, %v657_v55 }
 0x11f   :  { %v507_v0 = vadd.f32 %v958_v61, %v926_v59  ;;  %v498_v1 = vpop.f32.mrb[5].mxu0  ;;  %v927_v2 = vpop.f32.mrb[6].mxu1  ;;  %v772_v15 = vmul.f32 %v707_v26, %v660_v63 }
 0x120   :  { %v770_v4 = vmul.f32 %v697_v22, %v658_v60  ;;  %v499_v5 = vadd.f32 %v498_v1, %v272_v62  ;;  %v959_v6 = vpop.f32.mrb[6].mxu0  ;;  %v275_v7 = vpop.f32.mrb[7].mxu1 }
 0x121   :  { %v510_v9 = vadd.f32 %v959_v6, %v927_v2  ;;  %v501_v10 = vpop.f32.mrb[7].mxu0  ;;  %v647_v12 = vadd.f32 %v594_v27, %v507_v0  ;;  %v634_v56 = vpop.permute.xlu0 %633 }
 0x122   :  { %v785_v11 = vadd.f32 %v770_v4, %v769_v3  ;;  %v645_v13 = vadd.f32 %v584_v23, %v499_v5  ;;  %v502_v14 = vadd.f32 %v501_v10, %v275_v7  ;;  %v752_v61 = vpop.permute.xlu1 %751 }
 0x123   :  { %v648_v19 = vadd.f32 %v599_v29, %v510_v9  ;;  %v663_v22 = vmax.f32 %v647_v12, 0.0 }
 0x124   :  { %v786_v17 = vadd.f32 %v785_v11, %v771_v8  ;;  %v661_v18 = vmax.f32 %v645_v13, 0.0  ;;  %v646_v20 = vadd.f32 %v589_v25, %v502_v14 }
 0x125   :  { %v930_v21 = vpop.f32.mrb[8].mxu1  ;;  %v664_v46 = vmax.f32 %v648_v19, 0.0  ;;  %v639_v14 = vpop.permute.xlu0 %638 }
 0x126   :  { %v773_v40 = vmul.f32 %v712_v28, %v661_v18  ;;  %v787_v41 = vadd.f32 %v786_v17, %v772_v15  ;;  %v662_v42 = vmax.f32 %v646_v20, 0.0  ;;  %v962_v24 = vpop.f32.mrb[8].mxu0  ;;  %v288_v43 = vpop.f32.mrb[9].mxu1  ;;  %v775_v28 = vmul.f32 %v1346_v32, %v663_v22 }
 0x127   :  { %v523_v44 = vadd.f32 %v962_v24, %v930_v21  ;;  %v514_v45 = vpop.f32.mrb[9].mxu0  ;;  %v931_v27 = vpop.f32.mrb[10].mxu1  ;;  %v776_v58 = vmul.f32 %v1350_v34, %v664_v46 }
 0x128   :  { %v788_v23 = vadd.f32 %v787_v41, %v773_v40  ;;  %v774_v26 = vmul.f32 %v1342_v30, %v662_v42  ;;  %v515_v47 = vadd.f32 %v514_v45, %v288_v43  ;;  %v963_v48 = vpop.f32.mrb[10].mxu0  ;;  %v291_v49 = vpop.f32.mrb[11].mxu1 }
 0x129   :  { %v651_v25 = vadd.f32 %v1352_v35, %v523_v44  ;;  %v526_v29 = vadd.f32 %v963_v48, %v931_v27  ;;  %v517_v50 = vpop.f32.mrb[11].mxu0  ;;  %v762_v43 = vpop.permute.xlu0 %761 }
 0x12a   :  { %v789_v51 = vadd.f32 %v788_v23, %v774_v26  ;;  %v649_v52 = vadd.f32 %v1344_v31, %v515_v47  ;;  %v518_v53 = vadd.f32 %v517_v50, %v291_v49  ;;  %v807_v49 = vstv %s1399_s6 }
 0x12b   :  { %v652_v55 = vadd.f32 %v1356_v37, %v526_v29  ;;  %v667_v62 = vmax.f32 %v651_v25, 0.0 }
 0x12c   :  { %v790_v59 = vadd.f32 %v789_v51, %v775_v28  ;;  %v665_v30 = vmax.f32 %v649_v52, 0.0  ;;  %v650_v60 = vadd.f32 %v1348_v33, %v518_v53 }
 0x12d   :  { %v934_v35 = vpop.f32.mrb[12].mxu1  ;;  %v668_v31 = vmax.f32 %v652_v55, 0.0  ;;  %v779_v33 = vmul.f32 %v1362_v57, %v667_v62 }
 0x12e   :  { %v777_v63 = vmul.f32 %v1354_v36, %v665_v30  ;;  %v791_v0 = vadd.f32 %v790_v59, %v776_v58  ;;  %v666_v32 = vmax.f32 %v650_v60, 0.0  ;;  %v966_v1 = vpop.f32.mrb[12].mxu0  ;;  %v304_v2 = vpop.f32.mrb[13].mxu1 }
 0x12f   :  { %v539_v3 = vadd.f32 %v966_v1, %v934_v35  ;;  %v530_v4 = vpop.f32.mrb[13].mxu0  ;;  %v935_v37 = vpop.f32.mrb[14].mxu1  ;;  %v780_v15 = vmul.f32 %v747_v39, %v668_v31 }
 0x130   :  { %v792_v5 = vadd.f32 %v791_v0, %v777_v63  ;;  %v778_v34 = vmul.f32 %v1358_v38, %v666_v32  ;;  %v531_v6 = vadd.f32 %v530_v4, %v304_v2  ;;  %v967_v7 = vpop.f32.mrb[14].mxu0  ;;  %v307_v8 = vpop.f32.mrb[15].mxu1 }
 0x131   :  { %v542_v9 = vadd.f32 %v967_v7, %v935_v37  ;;  %v533_v10 = vpop.f32.mrb[15].mxu0  ;;  %v655_v36 = vadd.f32 %v634_v56, %v539_v3  ;;  %v757_v38 = vpop.permute.xlu1 %756 }
 0x132   :  { %v793_v11 = vadd.f32 %v792_v5, %v778_v34  ;;  %v653_v12 = vadd.f32 %v1360_v54, %v531_v6  ;;  %v534_v13 = vadd.f32 %v533_v10, %v307_v8 }
 0x133   :  { %v656_v19 = vadd.f32 %v639_v14, %v542_v9  ;;  %v671_v21 = vmax.f32 %v655_v36, 0.0 }
 0x134   :  { %v794_v17 = vadd.f32 %v793_v11, %v779_v33  ;;  %v669_v18 = vmax.f32 %v653_v12, 0.0  ;;  %v654_v20 = vadd.f32 %v1364_v16, %v534_v13 }
 0x135   :  { %v672_v42 = vmax.f32 %v656_v19, 0.0  ;;  %v783_v44 = vmul.f32 %v762_v43, %v671_v21  ;;  %v767_v54 = vpop.permute.xlu1 %766 }
 0x136   :  { %v781_v22 = vmul.f32 %v752_v61, %v669_v18  ;;  %v795_v40 = vadd.f32 %v794_v17, %v780_v15  ;;  %v670_v41 = vmax.f32 %v654_v20, 0.0 }
 0x137   :  { %v784_v27 = vmul.f32 %v767_v54, %v672_v42 }
 0x138   :  { %v796_v57 = vadd.f32 %v795_v40, %v781_v22  ;;  %v782_v24 = vmul.f32 %v757_v38, %v670_v41 }
 0x13a   :  { %v797_v45 = vadd.f32 %v796_v57, %v782_v24 }
 0x13c   :  { %v798_v23 = vadd.f32 %v797_v45, %v783_v44 }
 0x13e   :  { %v799_v39 = vadd.f32 %v798_v23, %v784_v27 }
 0x140   :  { %v800_v46 = vrot.slane %v799_v39, 4 }
 0x142   :  { %v801_v26 = vadd.f32 %v800_v46, %v799_v39 }
 0x144   :  { %v802_v47 = vrot.slane %v801_v26, 2 }
 0x146   :  { %v803_v48 = vadd.f32 %v802_v47, %v801_v26 }
 0x148   :  { %v804_v16 = vrot.slane %v803_v48, 1 }
 0x14a   :  { %v805_v25 = vadd.f32 %v804_v16, %v803_v48 }
 0x14c   :  { %v808_v29 = vadd.f32 %v807_v49, %v805_v25 }
 0x14e   :  { %809 = vst [vmem:[#allocation3] sm:$0x1] %v808_v29 }
 0x14f   :  { %1047 = shalt.err (!%p1044_p4)
}
 0x150   :  { %s1048_s12 = scalar_lea.hbm %s1400_s7, 16 }
 0x151   :  { %p1049_p5 = scmp.ne.s32.totalorder %s1400_s7, %s1048_s12  ;;  %p1052_p6 = scmp.lt.u32.totalorder %s1048_s12, %s1400_s7 }
 0x153   :  { %p1054_p7 = pnand %p1052_p6, %p1049_p5 }
 0x155   :  { %1057 = shalt.err (!%p1054_p7)
}
 0x156   :  { %819 = dma.vmem_to_hbm [thread:$0]  %s817_s30, 16, %s1400_s7, [#allocation4]  }
 0x157   :  { %1058 = dma.done.wait [#allocation4], 16  }
 0x158   :  { %1059 = vsyncadd [#allocation4], 4294967280 }
 0x159   :  { %823 = vsyncpa [#allocation4], 1 }

</bundles_post_ra>
